<compile_context>
chip_gen: v7x
topology: tpu7x:2x2x1
jax: 0.10.0
libtpu: 0.0.40
codegen_flags: <defaults>
</compile_context>

<pallas_src>
import jax
import jax.numpy as jnp
from jax.experimental import pallas as pl
from jax.experimental.pallas import tpu as pltpu


def _choose_row_tile(n_rows: int, n_batch: int, sublane_mult: int) -> int:
    """Rows (of 128 lanes) per grid step.

    Returns a multiple-of-`sublane_mult` divisor of `n_rows` whose dominant
    per-step block stays around <= 8 MiB (double-buffered working set well
    under v7x's 64 MiB VMEM), picking the largest such tile with at least two
    grid steps so the "parallel" axis shards across both v7x TensorCores.
    Falls back to a single full-extent tile when the rows cannot be split.
    """
    # Dominant pass (pass 2) streams ~5 f32 row-slabs per step:
    # g + masks(2) + pred + alpha.
    bytes_per_row = 5 * n_batch * 128 * 4
    s_cap = max(sublane_mult, (8 << 20) // bytes_per_row)
    if n_rows < 2 * sublane_mult:
        return n_rows
    best = None
    s = sublane_mult
    limit = min(n_rows // 2, s_cap)
    while s <= limit:
        if n_rows % s == 0:
            best = s            # keep the largest valid divisor
        s += sublane_mult
    return best if best is not None else n_rows


def _gray_stats_kernel(x_ref, g_ref, psum_ref, pm2_ref):
    """Grayscale + fused per-lane (sum, centered M2) partials for one row tile.

    x_ref:    (N, 3, S, 128)  native dtype
    g_ref:    (N, S, 128)     f32 grayscale
    psum_ref: (1, 8, 128)     f32 per-lane partial sum (broadcast on sublanes)
    pm2_ref:  (1, 8, 128)     f32 per-lane centered sum of squares
    """
    x = x_ref[...].astype(jnp.float32)              # cast in VMEM, not in HBM
    g = (x[:, 0] + x[:, 1] + x[:, 2]) * 0.5         # (N, S, 128)
    g_ref[...] = g

    g2 = g.reshape(-1, 128)                         # free collapse of (N, S)
    n_grp = g2.shape[0]                             # static rows per lane group
    lane_sum = jnp.sum(g2, axis=0)                  # (128,), sublane reduce
    lane_mean = lane_sum * (1.0 / n_grp)
    d = g2 - lane_mean[None, :]
    lane_m2 = jnp.sum(d * d, axis=0)                # (128,)

    # Broadcast across the 8 sublanes so the tiny partial store is a dense vst.
    psum_ref[...] = jnp.zeros(psum_ref.shape, jnp.float32) + lane_sum
    pm2_ref[...] = jnp.zeros(pm2_ref.shape, jnp.float32) + lane_m2


def _normalize_kernel(stats_ref, g_ref, masks_ref, pred_ref, alpha_ref):
    """norm = (g - mean) * inv_std; masks = [norm, 1 - norm]; pred; alpha = 1."""
    mean = stats_ref[0]
    inv_std = stats_ref[1]
    norm = (g_ref[...] - mean) * inv_std            # (N, S, 128)
    pred_ref[...] = norm
    # The unit dim is a major axis here, so both sub-writes are dense (S, 128)
    # unmasked stores.
    masks_ref[:, 0:1] = norm[:, None]
    masks_ref[:, 1:2] = (1.0 - norm)[:, None]
    alpha_ref[...] = jnp.ones_like(norm)


@jax.jit
def alpha_model_forward(x):
    """Pallas implementation of AlphaModel.forward (useFreeCOS=True path)."""
    N, C, H, W = x.shape
    assert C == 3, "d_in = 3"
    HW = H * W
    # TODO(synk): H*W not a multiple of 128 needs a masked tail tile; unhandled.
    assert HW % 128 == 0, "H*W must be a multiple of 128"
    R = HW // 128

    itemsize = jnp.dtype(x.dtype).itemsize
    sublane_mult = max(8, 32 // max(1, itemsize))   # f32: 8, bf16: 16, u8: 32
    S = _choose_row_tile(R, N, sublane_mult)
    nt = R // S

    x4 = x.reshape(N, C, R, 128)                    # free, contiguous reshape

    # Scoped-VMEM budget derived from the actual (double-buffered) blocks.
    p1_bytes = N * C * S * 128 * itemsize + N * S * 128 * 4 + 2 * 8 * 128 * 4
    p2_bytes = 5 * N * S * 128 * 4                  # g + masks(2) + pred + alpha
    vmem_limit = int(max(2 * max(p1_bytes, p2_bytes) + (2 << 20), 32 << 20))
    cparams = pltpu.CompilerParams(
        dimension_semantics=("parallel",),          # megacore-shardable on v7x
        vmem_limit_bytes=vmem_limit,
    )

    # ---- pass 1: grayscale + fused per-lane (sum, centered M2) partials -----
    g, psum, pm2 = pl.pallas_call(
        _gray_stats_kernel,
        out_shape=(
            jax.ShapeDtypeStruct((N, R, 128), jnp.float32),
            jax.ShapeDtypeStruct((nt, 8, 128), jnp.float32),
            jax.ShapeDtypeStruct((nt, 8, 128), jnp.float32),
        ),
        grid=(nt,),
        in_specs=[pl.BlockSpec((N, C, S, 128), lambda i: (0, 0, i, 0))],
        out_specs=(
            pl.BlockSpec((N, S, 128), lambda i: (0, i, 0)),
            pl.BlockSpec((1, 8, 128), lambda i: (i, 0, 0)),
            pl.BlockSpec((1, 8, 128), lambda i: (i, 0, 0)),
        ),
        compiler_params=cparams,
    )(x4)

    # ---- merge partials: Chan's parallel variance over (tile, lane) groups --
    n_grp = N * S                                   # elements per group
    n_elems = N * HW
    lane_sum = psum[:, 0, :]                        # (nt, 128)
    lane_m2 = pm2[:, 0, :]                          # (nt, 128)
    mean = jnp.sum(lane_sum) / n_elems
    grp_mean = lane_sum / n_grp
    m2_total = jnp.sum(lane_m2) + n_grp * jnp.sum((grp_mean - mean) ** 2)
    var = m2_total / (n_elems - 1)                  # ddof=1, like torch.std
    inv_std = jax.lax.rsqrt(var)                    # scalar, one-time
    stats = jnp.stack([mean, inv_std]).astype(jnp.float32)    # (2,) -> SMEM

    # ---- pass 2: normalize; emit masks / pred / alpha directly --------------
    # TODO(synk): Segment_model(x)['pred'] (external checkpointed UNet) would
    # be applied here; identity is used on the normalized grayscale.
    masks4, pred4, alpha4 = pl.pallas_call(
        _normalize_kernel,
        out_shape=(
            jax.ShapeDtypeStruct((N, 2, R, 128), jnp.float32),
            jax.ShapeDtypeStruct((N, R, 128), jnp.float32),
            jax.ShapeDtypeStruct((N, R, 128), jnp.float32),
        ),
        grid=(nt,),
        in_specs=[
            pl.BlockSpec(memory_space=pltpu.MemorySpace.SMEM),
            pl.BlockSpec((N, S, 128), lambda i: (0, i, 0)),
        ],
        out_specs=(
            pl.BlockSpec((N, 2, S, 128), lambda i: (0, 0, i, 0)),
            pl.BlockSpec((N, S, 128), lambda i: (0, i, 0)),
            pl.BlockSpec((N, S, 128), lambda i: (0, i, 0)),
        ),
        compiler_params=cparams,
    )(stats, g)

    # Pure-metadata reshapes back to the torch output shapes.
    masks = masks4.reshape(N, 2, 1, H, W)           # cat([x, 1 - x], dim=1)
    pred = pred4.reshape(N, 1, 1, H, W)             # x.unsqueeze(2)
    alpha = alpha4.reshape(N, 1, 1, H, W)           # torch.ones_like(x)
    return {"masks": masks, "alpha": alpha, "pred": pred}


def alpha_model_reference(x):
    """Pure-JAX reference mirroring the torch forward (identity backbone)."""
    x = x.astype(jnp.float32)
    g = (x[:, 0:1] + x[:, 1:2] + x[:, 2:3]) / 2.0   # (N, 1, H, W)
    mean = jnp.mean(g)
    n = g.size
    std = jnp.sqrt(jnp.sum((g - mean) ** 2) / (n - 1))
    gn = (g - mean) / std
    pred = gn[:, :, None, :, :]                     # (N, 1, 1, H, W)
    masks = jnp.concatenate([pred, 1.0 - pred], axis=1)
    alpha = jnp.ones_like(pred)
    return {"masks": masks, "alpha": alpha, "pred": pred}


if __name__ == "__main__":
    key = jax.random.PRNGKey(0)
    N, C, H, W = 2, 3, 16, 16
    x = jax.random.uniform(key, (N, C, H, W), dtype=jnp.float32)

    out = alpha_model_forward(x)
    jax.block_until_ready(out)

    ref = alpha_model_reference(x)
    assert out["masks"].shape == (N, 2, 1, H, W)
    assert out["alpha"].shape == (N, 1, 1, H, W)
    assert out["pred"].shape == (N, 1, 1, H, W)
    for k in ("masks", "alpha", "pred"):
        assert jnp.allclose(out[k], ref[k], rtol=1e-5, atol=1e-5), k

    print("KERNEL_OK")
</pallas_src>

<mosaic_0001>
module attributes {stable_mosaic.version = 11 : i64} {
  func.func @_gray_stats_kernel(%arg0: i32, %arg1: memref<2x3x2x128xf32, #tpu.memory_space<vmem>>, %arg2: memref<2x2x128xf32, #tpu.memory_space<vmem>>, %arg3: memref<1x8x128xf32, #tpu.memory_space<vmem>>, %arg4: memref<1x8x128xf32, #tpu.memory_space<vmem>>) attributes {dimension_semantics = [#tpu.dimension_semantics<parallel>], iteration_bounds = array<i64: 1>, scalar_prefetch = 0 : i64, scratch_operands = 0 : i64, tpu.core_type = #tpu.core_type<tc>, window_params = [{transform_indices = @transform_0, window_bounds = array<i64: 2, 3, 2, 128>}, {transform_indices = @transform_1, window_bounds = array<i64: 2, 2, 128>}, {transform_indices = @transform_2, window_bounds = array<i64: 1, 8, 128>}, {transform_indices = @transform_3, window_bounds = array<i64: 1, 8, 128>}]} {
    %c0 = arith.constant 0 : index
    %c0_0 = arith.constant 0 : index
    %c0_1 = arith.constant 0 : index
    %c0_2 = arith.constant 0 : index
    %0 = vector.load %arg1[%c0, %c0_0, %c0_1, %c0_2] : memref<2x3x2x128xf32, #tpu.memory_space<vmem>>, vector<2x3x2x128xf32>
    %1 = vector.extract_strided_slice %0 {offsets = [0, 0, 0, 0], sizes = [2, 1, 2, 128], strides = [1, 1, 1, 1]} : vector<2x3x2x128xf32> to vector<2x1x2x128xf32>
    %2 = vector.shape_cast %1 : vector<2x1x2x128xf32> to vector<2x2x128xf32>
    %3 = vector.extract_strided_slice %0 {offsets = [0, 1, 0, 0], sizes = [2, 1, 2, 128], strides = [1, 1, 1, 1]} : vector<2x3x2x128xf32> to vector<2x1x2x128xf32>
    %4 = vector.shape_cast %3 : vector<2x1x2x128xf32> to vector<2x2x128xf32>
    %5 = arith.addf %2, %4 : vector<2x2x128xf32>
    %6 = vector.extract_strided_slice %0 {offsets = [0, 2, 0, 0], sizes = [2, 1, 2, 128], strides = [1, 1, 1, 1]} : vector<2x3x2x128xf32> to vector<2x1x2x128xf32>
    %7 = vector.shape_cast %6 : vector<2x1x2x128xf32> to vector<2x2x128xf32>
    %8 = arith.addf %5, %7 : vector<2x2x128xf32>
    %cst = arith.constant 5.000000e-01 : f32
    %9 = vector.broadcast %cst : f32 to vector<2x2x128xf32>
    %10 = arith.mulf %8, %9 : vector<2x2x128xf32>
    %c0_3 = arith.constant 0 : index
    %c0_4 = arith.constant 0 : index
    %c0_5 = arith.constant 0 : index
    %11 = vector.load %arg2[%c0_3, %c0_4, %c0_5] : memref<2x2x128xf32, #tpu.memory_space<vmem>>, vector<2x2x128xf32>
    tpu.vector_store %arg2[%c0_3, %c0_4, %c0_5], %10 {strides = array<i32>} : memref<2x2x128xf32, #tpu.memory_space<vmem>>, vector<2x2x128xf32>,
    %12 = vector.shape_cast %10 : vector<2x2x128xf32> to vector<4x128xf32>
    %cst_6 = arith.constant dense<0.000000e+00> : vector<128xf32>
    %13 = vector.multi_reduction <add>, %12, %cst_6 [0] : vector<4x128xf32> to vector<128xf32>
    %cst_7 = arith.constant 2.500000e-01 : f32
    %14 = vector.broadcast %cst_7 : f32 to vector<128xf32>
    %15 = arith.mulf %13, %14 : vector<128xf32>
    %16 = vector.shape_cast %15 : vector<128xf32> to vector<1x128xf32>
    %17 = vector.broadcast %16 : vector<1x128xf32> to vector<4x128xf32>
    %18 = arith.subf %12, %17 : vector<4x128xf32>
    %19 = arith.mulf %18, %18 : vector<4x128xf32>
    %cst_8 = arith.constant dense<0.000000e+00> : vector<128xf32>
    %20 = vector.multi_reduction <add>, %19, %cst_8 [0] : vector<4x128xf32> to vector<128xf32>
    %cst_9 = arith.constant 0.000000e+00 : f32
    %21 = vector.broadcast %cst_9 : f32 to vector<1x8x128xf32>
    %22 = vector.shape_cast %13 : vector<128xf32> to vector<1x1x128xf32>
    %23 = vector.broadcast %22 : vector<1x1x128xf32> to vector<1x8x128xf32>
    %24 = arith.addf %21, %23 : vector<1x8x128xf32>
    %c0_10 = arith.constant 0 : index
    %c0_11 = arith.constant 0 : index
    %c0_12 = arith.constant 0 : index
    %25 = vector.load %arg3[%c0_10, %c0_11, %c0_12] : memref<1x8x128xf32, #tpu.memory_space<vmem>>, vector<1x8x128xf32>
    tpu.vector_store %arg3[%c0_10, %c0_11, %c0_12], %24 {strides = array<i32>} : memref<1x8x128xf32, #tpu.memory_space<vmem>>, vector<1x8x128xf32>,
    %cst_13 = arith.constant 0.000000e+00 : f32
    %26 = vector.broadcast %cst_13 : f32 to vector<1x8x128xf32>
    %27 = vector.shape_cast %20 : vector<128xf32> to vector<1x1x128xf32>
    %28 = vector.broadcast %27 : vector<1x1x128xf32> to vector<1x8x128xf32>
    %29 = arith.addf %26, %28 : vector<1x8x128xf32>
    %c0_14 = arith.constant 0 : index
    %c0_15 = arith.constant 0 : index
    %c0_16 = arith.constant 0 : index
    %30 = vector.load %arg4[%c0_14, %c0_15, %c0_16] : memref<1x8x128xf32, #tpu.memory_space<vmem>>, vector<1x8x128xf32>
    tpu.vector_store %arg4[%c0_14, %c0_15, %c0_16], %29 {strides = array<i32>} : memref<1x8x128xf32, #tpu.memory_space<vmem>>, vector<1x8x128xf32>,
    return
  }
  func.func @transform_0(%arg0: i32) -> (i32, i32, i32, i32) {
    %c0_i32 = arith.constant 0 : i32
    %c0_i32_0 = arith.constant 0 : i32
    %c0_i32_1 = arith.constant 0 : i32
    %c0_i32_2 = arith.constant 0 : i32
    return %c0_i32, %c0_i32_0, %arg0, %c0_i32_1 : i32, i32, i32, i32
  }
  func.func @transform_1(%arg0: i32) -> (i32, i32, i32) {
    %c0_i32 = arith.constant 0 : i32
    %c0_i32_0 = arith.constant 0 : i32
    %c0_i32_1 = arith.constant 0 : i32
    return %c0_i32, %arg0, %c0_i32_0 : i32, i32, i32
  }
  func.func @transform_2(%arg0: i32) -> (i32, i32, i32) {
    %c0_i32 = arith.constant 0 : i32
    %c0_i32_0 = arith.constant 0 : i32
    %c0_i32_1 = arith.constant 0 : i32
    return %arg0, %c0_i32, %c0_i32_0 : i32, i32, i32
  }
  func.func @transform_3(%arg0: i32) -> (i32, i32, i32) {
    %c0_i32 = arith.constant 0 : i32
    %c0_i32_0 = arith.constant 0 : i32
    %c0_i32_1 = arith.constant 0 : i32
    return %arg0, %c0_i32, %c0_i32_0 : i32, i32, i32
  }
}

module attributes {stable_mosaic.version = 11 : i64} {
  func.func @_normalize_kernel(%arg0: i32, %arg1: memref<2xf32, #tpu.memory_space<smem>>, %arg2: memref<2x2x128xf32, #tpu.memory_space<vmem>>, %arg3: memref<2x2x2x128xf32, #tpu.memory_space<vmem>>, %arg4: memref<2x2x128xf32, #tpu.memory_space<vmem>>, %arg5: memref<2x2x128xf32, #tpu.memory_space<vmem>>) attributes {dimension_semantics = [#tpu.dimension_semantics<parallel>], iteration_bounds = array<i64: 1>, scalar_prefetch = 0 : i64, scratch_operands = 0 : i64, tpu.core_type = #tpu.core_type<tc>, window_params = [{transform_indices = @transform_0, window_bounds = array<i64: 2>}, {transform_indices = @transform_1, window_bounds = array<i64: 2, 2, 128>}, {transform_indices = @transform_2, window_bounds = array<i64: 2, 2, 2, 128>}, {transform_indices = @transform_3, window_bounds = array<i64: 2, 2, 128>}, {transform_indices = @transform_4, window_bounds = array<i64: 2, 2, 128>}]} {
    %c0 = arith.constant 0 : index
    %0 = memref.load %arg1[%c0] : memref<2xf32, #tpu.memory_space<smem>>
    %c1 = arith.constant 1 : index
    %1 = memref.load %arg1[%c1] : memref<2xf32, #tpu.memory_space<smem>>
    %c0_0 = arith.constant 0 : index
    %c0_1 = arith.constant 0 : index
    %c0_2 = arith.constant 0 : index
    %2 = vector.load %arg2[%c0_0, %c0_1, %c0_2] : memref<2x2x128xf32, #tpu.memory_space<vmem>>, vector<2x2x128xf32>
    %3 = vector.broadcast %0 : f32 to vector<2x2x128xf32>
    %4 = arith.subf %2, %3 : vector<2x2x128xf32>
    %5 = vector.broadcast %1 : f32 to vector<2x2x128xf32>
    %6 = arith.mulf %4, %5 : vector<2x2x128xf32>
    %c0_3 = arith.constant 0 : index
    %c0_4 = arith.constant 0 : index
    %c0_5 = arith.constant 0 : index
    %7 = vector.load %arg4[%c0_3, %c0_4, %c0_5] : memref<2x2x128xf32, #tpu.memory_space<vmem>>, vector<2x2x128xf32>
    tpu.vector_store %arg4[%c0_3, %c0_4, %c0_5], %6 {strides = array<i32>} : memref<2x2x128xf32, #tpu.memory_space<vmem>>, vector<2x2x128xf32>,
    %8 = vector.shape_cast %6 : vector<2x2x128xf32> to vector<2x1x2x128xf32>
    %c0_6 = arith.constant 0 : index
    %c0_7 = arith.constant 0 : index
    %c0_8 = arith.constant 0 : index
    %c0_9 = arith.constant 0 : index
    %9 = vector.load %arg3[%c0_6, %c0_7, %c0_8, %c0_9] : memref<2x2x2x128xf32, #tpu.memory_space<vmem>>, vector<2x1x2x128xf32>
    tpu.vector_store %arg3[%c0_6, %c0_7, %c0_8, %c0_9], %8 {strides = array<i32>} : memref<2x2x2x128xf32, #tpu.memory_space<vmem>>, vector<2x1x2x128xf32>,
    %cst = arith.constant 1.000000e+00 : f32
    %10 = vector.broadcast %cst : f32 to vector<2x2x128xf32>
    %11 = arith.subf %10, %6 : vector<2x2x128xf32>
    %12 = vector.shape_cast %11 : vector<2x2x128xf32> to vector<2x1x2x128xf32>
    %c0_10 = arith.constant 0 : index
    %c1_11 = arith.constant 1 : index
    %c0_12 = arith.constant 0 : index
    %c0_13 = arith.constant 0 : index
    %13 = vector.load %arg3[%c0_10, %c1_11, %c0_12, %c0_13] : memref<2x2x2x128xf32, #tpu.memory_space<vmem>>, vector<2x1x2x128xf32>
    tpu.vector_store %arg3[%c0_10, %c1_11, %c0_12, %c0_13], %12 {strides = array<i32>} : memref<2x2x2x128xf32, #tpu.memory_space<vmem>>, vector<2x1x2x128xf32>,
    %cst_14 = arith.constant 1.000000e+00 : f32
    %14 = vector.broadcast %cst_14 : f32 to vector<2x2x128xf32>
    %c0_15 = arith.constant 0 : index
    %c0_16 = arith.constant 0 : index
    %c0_17 = arith.constant 0 : index
    %15 = vector.load %arg5[%c0_15, %c0_16, %c0_17] : memref<2x2x128xf32, #tpu.memory_space<vmem>>, vector<2x2x128xf32>
    tpu.vector_store %arg5[%c0_15, %c0_16, %c0_17], %14 {strides = array<i32>} : memref<2x2x128xf32, #tpu.memory_space<vmem>>, vector<2x2x128xf32>,
    return
  }
  func.func @transform_0(%arg0: i32) -> i32 {
    %c0_i32 = arith.constant 0 : i32
    %c0_i32_0 = arith.constant 0 : i32
    return %c0_i32 : i32
  }
  func.func @transform_1(%arg0: i32) -> (i32, i32, i32) {
    %c0_i32 = arith.constant 0 : i32
    %c0_i32_0 = arith.constant 0 : i32
    %c0_i32_1 = arith.constant 0 : i32
    return %c0_i32, %arg0, %c0_i32_0 : i32, i32, i32
  }
  func.func @transform_2(%arg0: i32) -> (i32, i32, i32, i32) {
    %c0_i32 = arith.constant 0 : i32
    %c0_i32_0 = arith.constant 0 : i32
    %c0_i32_1 = arith.constant 0 : i32
    %c0_i32_2 = arith.constant 0 : i32
    return %c0_i32, %c0_i32_0, %arg0, %c0_i32_1 : i32, i32, i32, i32
  }
  func.func @transform_3(%arg0: i32) -> (i32, i32, i32) {
    %c0_i32 = arith.constant 0 : i32
    %c0_i32_0 = arith.constant 0 : i32
    %c0_i32_1 = arith.constant 0 : i32
    return %c0_i32, %arg0, %c0_i32_0 : i32, i32, i32
  }
  func.func @transform_4(%arg0: i32) -> (i32, i32, i32) {
    %c0_i32 = arith.constant 0 : i32
    %c0_i32_0 = arith.constant 0 : i32
    %c0_i32_1 = arith.constant 0 : i32
    return %c0_i32, %arg0, %c0_i32_0 : i32, i32, i32
  }
}

</mosaic_0001>

<bundles_post_ra>
// kernel: alpha_model_forward.3
= control target key start
LH: loop header
LB: loop body
LE: loop exit
PB: predicated region body
PF: predicated region fallthrough
CT: control target
= control target key end

     0   :  { %10 = vsyncpa [#allocation3], 0  ;;  %s140_s0 = inlined_call_operand.vmem [shape: f32[2], index: 0, kind: input, shape index: {}]   ;;  %s141_s1 = inlined_call_operand.vmem [shape: f32[2,2,128], index: 1, kind: input, shape index: {}]   ;;  %s142_s2 = inlined_call_operand.vmem [shape: f32[2,2,2,128], index: 2, kind: output, shape index: {0}]   ;;  %s143_s3 = inlined_call_operand.vmem [shape: f32[2,2,128], index: 3, kind: output, shape index: {1}]   ;;  %s144_s4 = inlined_call_operand.vmem [shape: f32[2,2,128], index: 4, kind: output, shape index: {2}]  }
   0x1   :  { %s17_s17 = sshll.u32 %s140_s0, 4  ;;  %s18_s17 = int_to_ptr.vmem [resolvable:$true] %s17_s17 }
   0x2   :  { %s66_s18 = scalar_lea.vmem %s18_s17, 16  ;;  %p71_p1 = scmp.lt.s32.totalorder %s18_s17, %s18_s17 }
   0x3   :  { %p67_p0 = scmp.ne.s32.totalorder %s18_s17, %s66_s18  ;;  %p72_p2 = scmp.lt.s32.totalorder %s66_s18, %s66_s18 }
   0x5   :  { %p73_p3 = por %p72_p2, %p71_p1 }
   0x7   :  { %p74_p4 = pnand %p73_p3, %p67_p0 }
   0x9   :  { %77 = shalt.err (!%p74_p4)
}
   0xa   :  { %s80_s19 = smov [#allocation2]  }
   0xb   :  { %20 = dma.vmem_to_smem %s18_s17, 16, %s80_s19, [#allocation3]  }
   0xc   :  { %78 = dma.done.wait [#allocation3], 16  }
   0xd   :  { %79 = vsyncadd [#allocation3], 4294967280 }
   0xe   :  { %26 = sfence }
   0xf   :  { %s27_s20 = sld [smem:[#allocation2]]  ;;  %s61_s21 = sld [smem:[#allocation2 + $0x1]]  ;;  %v81_v0 = vmov 1.0   ;;  %v29_v1 = vld [vmem:[%s141_s1] sm:$0x3] }
  0x10   :  { %46 = vst [vmem:[%s144_s4] sm:$0x3] %v81_v0  ;;  %47 = vst [vmem:[%s144_s4 + $0x2] sm:$0x3] %v81_v0  ;;  %v30_v2 = vld [vmem:[%s141_s1 + $0x2] sm:$0x3] }
  0x15   :  { %v31_v3 = vstv %s27_s20  ;;  %v34_v4 = vstv %s61_s21 }
  0x16   :  { %v32_v5 = vsub.f32 %v29_v1, %v31_v3  ;;  %v33_v6 = vsub.f32 %v30_v2, %v31_v3 }
  0x18   :  { %v35_v7 = vmul.f32 %v34_v4, %v32_v5  ;;  %v36_v8 = vmul.f32 %v34_v4, %v33_v6 }
  0x1a   :  { %37 = vst [vmem:[%s143_s3] sm:$0x3] %v35_v7  ;;  %39 = vst [vmem:[%s142_s2] sm:$0x3] %v35_v7  ;;  %v41_v9 = vsub.f32 1.0, %v35_v7  ;;  %v42_v10 = vsub.f32 1.0, %v36_v8 }
  0x1b   :  { %38 = vst [vmem:[%s143_s3 + $0x2] sm:$0x3] %v36_v8  ;;  %40 = vst [vmem:[%s142_s2 + $0x4] sm:$0x3] %v36_v8 }
  0x1c   :  { %62 = vst [vmem:[%s142_s2 + $0x2] sm:$0x3] %v41_v9  ;;  %63 = vst [vmem:[%s142_s2 + $0x6] sm:$0x3] %v42_v10 }
  0x1d   :  { %60 = vsyncpa [#allocation3], 1 }

// kernel: alpha_model_forward.2
= control target key start
LH: loop header
LB: loop body
LE: loop exit
PB: predicated region body
PF: predicated region fallthrough
CT: control target
= control target key end

     0   :  { %v31_v0 = vlaneseq  ;;  %v95_v4 = vmov 1983009808   ;;  %vm36_vm0 = vcmask 1043456   ;;  %s148_s0 = inlined_call_operand.vmem [shape: f32[2,3,2,128], index: 0, kind: input, shape index: {}]   ;;  %s149_s1 = inlined_call_operand.vmem [shape: f32[2,2,128], index: 1, kind: output, shape index: {0}]   ;;  %s150_s2 = inlined_call_operand.vmem [shape: f32[1,8,128], index: 2, kind: output, shape index: {1}]   ;;  %s151_s3 = inlined_call_operand.vmem [shape: f32[1,8,128], index: 3, kind: output, shape index: {2}]  }
   0x1   :  { %v11_v1 = vld [vmem:[%s148_s0] sm:$0x3]  ;;  %v12_v2 = vld [vmem:[%s148_s0 + $0x2] sm:$0x3]  ;;  %v13_v3 = vld [vmem:[%s148_s0 + $0x4] sm:$0x3]  ;;  %v29_v5 = vunpack.c.l.s4 %v95_v4 }
   0x2   :  { %v17_v6 = vadd.f32 %v12_v2, %v11_v1  ;;  %v14_v7 = vld [vmem:[%s148_s0 + $0x6] sm:$0x3]  ;;  %v15_v8 = vld [vmem:[%s148_s0 + $0x8] sm:$0x3]  ;;  %v16_v9 = vld [vmem:[%s148_s0 + $0xa] sm:$0x3] }
   0x3   :  { %v18_v10 = vadd.f32 %v15_v8, %v14_v7  ;;  %v30_v11 = vunpack.c.0.s8 %v29_v5  ;;  %v32_v12 = vshrl.u32 %v31_v0, 7 }
   0x4   :  { %v19_v13 = vadd.f32 %v17_v6, %v13_v3 }
   0x5   :  { %v20_v14 = vadd.f32 %v18_v10, %v16_v9  ;;  %v33_v17 = vsub.s32 %v30_v11, %v32_v12 }
   0x6   :  { %v21_v15 = vmul.f32 0.5, %v19_v13 }
   0x7   :  { %v22_v16 = vmul.f32 0.5, %v20_v14 }
   0x8   :  { %23 = vst [vmem:[%s149_s1] sm:$0x3] %v21_v15 }
   0x9   :  { %24 = vst [vmem:[%s149_s1 + $0x2] sm:$0x3] %v22_v16  ;;  %v27_v18 = vcombine.low %v21_v15, %v22_v16 }
   0xb   :  { %v34_v19 = vrot.slane %v27_v18, %v33_v17 }
   0xd   :  { %v37_v20 = vsel %vm36_vm0, %v34_v19, 0.0 }
   0xe   :  { %v38_v21 = vrot.slane %v37_v20, 4 }
  0x10   :  { %v39_v22 = vadd.f32 %v38_v21, %v37_v20 }
  0x12   :  { %v40_v23 = vrot.slane %v39_v22, 2 }
  0x14   :  { %v41_v24 = vadd.f32 %v40_v23, %v39_v22 }
  0x16   :  { %v42_v25 = vrot.slane %v41_v24, 1 }
  0x18   :  { %v43_v26 = vadd.f32 %v42_v25, %v41_v24 }
  0x1a   :  { %v44_v27 = vmul.f32 0.25, %v43_v26  ;;  %79 = vst [vmem:[%s150_s2] sm:$0xff] %v43_v26 }
  0x1c   :  { %v52_v28 = vrot.slane %v44_v27, %v33_v17 }
  0x1e   :  { %v53_v29 = vcombine.high %v52_v28, %v52_v28  ;;  %v56_v30 = vsub.f32 %v21_v15, %v52_v28 }
  0x20   :  { %v57_v31 = vsub.f32 %v22_v16, %v53_v29  ;;  %v58_v32 = vmul.f32 %v56_v30, %v56_v30 }
  0x22   :  { %v59_v33 = vmul.f32 %v57_v31, %v57_v31 }
  0x24   :  { %v62_v34 = vcombine.low %v58_v32, %v59_v33 }
  0x26   :  { %v69_v35 = vrot.slane %v62_v34, %v33_v17 }
  0x28   :  { %v71_v36 = vsel %vm36_vm0, %v69_v35, 0.0 }
  0x29   :  { %v72_v37 = vrot.slane %v71_v36, 4 }
  0x2b   :  { %v73_v38 = vadd.f32 %v72_v37, %v71_v36 }
  0x2d   :  { %v74_v39 = vrot.slane %v73_v38, 2 }
  0x2f   :  { %v75_v40 = vadd.f32 %v74_v39, %v73_v38 }
  0x31   :  { %v76_v41 = vrot.slane %v75_v40, 1 }
  0x33   :  { %v77_v42 = vadd.f32 %v76_v41, %v75_v40 }
  0x35   :  { %81 = vst [vmem:[%s151_s3] sm:$0xff] %v77_v42 }

</bundles_post_ra>
